<compile_context>
chip_gen: v5e
topology: v5e:2x2
jax: 0.10.0
libtpu: 0.0.40
codegen_flags: <defaults>
</compile_context>

<pallas_src>
import functools
import math

import jax
import jax.numpy as jnp
from jax import lax
from jax.experimental import pallas as pl
from jax.experimental.pallas import tpu as pltpu


_SQRT_HALF = 1.0 / math.sqrt(2.0)


# ------------------------------ erf / gelu ---------------------------------
def _erf(x):
    # Abramowitz & Stegun 7.1.26 polynomial (|err| < 1.5e-7), built only from
    # ops guaranteed to lower in Mosaic.  The divide is replaced by an EUP
    # approximate reciprocal and sign()*y by a single select so the chain
    # stays off the VALU slot as much as possible.
    p = 0.3275911
    a1, a2, a3, a4, a5 = (0.254829592, -0.284496736, 1.421413741,
                          -1.453152027, 1.061405429)
    ax = jnp.abs(x)
    t = pl.reciprocal(1.0 + p * ax, approx=True)      # EUP, not VALU
    poly = ((((a5 * t + a4) * t + a3) * t + a2) * t + a1) * t
    y = 1.0 - poly * jnp.exp(-ax * ax)                 # exp -> EUP
    return jnp.where(x >= 0.0, y, -y)                  # one select vs sign()*


def _gelu_exact(x):
    # HuggingFace "gelu" (erf-exact form), matching nn.functional.gelu default.
    return 0.5 * x * (1.0 + _erf(x * _SQRT_HALF))


# ------------------------------ fused kernel -------------------------------
def _transform_kernel(x_ref, w_ref, b_ref, g_ref, beta_ref, o_ref, *,
                      eps, act, mxu_dtype):
    x = x_ref[...]
    w = w_ref[...]
    if mxu_dtype is not None:                # bf16 MXU operands, f32 accum
        x = x.astype(mxu_dtype)
        w = w.astype(mxu_dtype)

    # dense: [TM, H] @ [H, H] + [1, H]  (f32 accumulation on the MXU)
    y = jnp.dot(x, w, preferred_element_type=jnp.float32)
    y = y + b_ref[...].astype(jnp.float32)

    # activation (f32)
    if act == "gelu":            # erf-exact (HF default for BERT)
        y = _gelu_exact(y)
    elif act == "gelu_new":      # tanh approximation
        y = jax.nn.gelu(y, approximate=True)
    elif act == "relu":
        y = jnp.maximum(y, 0.0)
    else:
        raise ValueError(f"unsupported activation: {act}")

    # LayerNorm over the hidden (last, lane) dimension — single-pass stats.
    mu = jnp.mean(y, axis=-1, keepdims=True)
    ms = jnp.mean(y * y, axis=-1, keepdims=True)
    var = jnp.maximum(ms - mu * mu, 0.0)
    inv = lax.rsqrt(var + eps)                         # EUP
    o_ref[...] = ((y - mu) * inv * g_ref[...].astype(jnp.float32)
                  + beta_ref[...].astype(jnp.float32)).astype(o_ref.dtype)


# ------------------------------ wrapper -------------------------------------
def _round_up(a, m):
    return (a + m - 1) // m * m


def bert_prediction_head_transform(x, w, b, gamma, beta, *, eps=1e-12,
                                    act="gelu", block_rows=512,
                                    mxu_dtype=jnp.bfloat16):
    """y = LayerNorm(act(x @ w + b)) fused in a single Pallas TPU kernel.

    x:              [..., H]   (output dtype follows x.dtype)
    w:              [H, H]
    b, gamma, beta: [H] or [1, H]
    """
    orig_shape = x.shape
    H = orig_shape[-1]
    out_dtype = x.dtype

    # Accept the natural PyTorch [H] parameter vectors.
    b = jnp.asarray(b).reshape(1, H)
    gamma = jnp.asarray(gamma).reshape(1, H)
    beta = jnp.asarray(beta).reshape(1, H)
    w = jnp.asarray(w)
    if mxu_dtype is not None:
        # Cast the resident weight once in the wrapper: halves its DMA traffic
        # and VMEM footprint.  Activations are cast inside the kernel instead
        # (casting x in the wrapper would add a full extra HBM pass).
        w = w.astype(mxu_dtype)

    x2 = x.reshape(-1, H)
    N = x2.shape[0]

    # Row tile: multiple of the sublane packing, capped at block_rows.  Ensure
    # >= 2 grid steps whenever rows allow it so v7x's two TCs both get work.
    sub = max(8, 32 // jnp.dtype(x2.dtype).itemsize)
    tm = min(block_rows, _round_up(N, sub))
    if _round_up(N, tm) // tm < 2 and N > sub:
        tm = _round_up(pl.cdiv(N, 2), sub)
    n_pad = _round_up(N, tm)
    if n_pad != N:
        # Pad rows instead of collapsing to one giant block: rows are fully
        # independent (per-row LayerNorm); padded rows are sliced off below.
        x2 = jnp.pad(x2, ((0, n_pad - N), (0, 0)))
    grid = (n_pad // tm,)

    in_bytes = x2.dtype.itemsize
    w_bytes = w.dtype.itemsize
    out_bytes = jnp.dtype(out_dtype).itemsize
    # Rough scoped-VMEM budget: double-buffered x/out tiles, pipelined weight,
    # param vectors, plus f32 intermediates; clamp to v7x's 64 MiB physical.
    vmem_bytes = (2 * tm * H * in_bytes + 2 * tm * H * out_bytes
                  + 2 * H * H * w_bytes + 8 * H * 4 + 6 * tm * H * 4)
    vmem_limit = int(min(max(vmem_bytes, 32 * 1024 * 1024), 64 * 1024 * 1024))

    cost = pl.CostEstimate(
        flops=2 * n_pad * H * H,
        transcendentals=2 * n_pad * H,                 # exp (erf) + rsqrt
        bytes_accessed=(n_pad * H * in_bytes + H * H * w_bytes
                        + 3 * H * 4 + n_pad * H * out_bytes),
    )

    out = pl.pallas_call(
        functools.partial(_transform_kernel, eps=eps, act=act,
                          mxu_dtype=mxu_dtype),
        grid=grid,
        in_specs=[
            pl.BlockSpec((tm, H), lambda i: (i, 0)),   # activations, row-tiled
            pl.BlockSpec((H, H), lambda i: (0, 0)),    # dense weight (resident)
            pl.BlockSpec((1, H), lambda i: (0, 0)),    # dense bias
            pl.BlockSpec((1, H), lambda i: (0, 0)),    # LN gamma
            pl.BlockSpec((1, H), lambda i: (0, 0)),    # LN beta
        ],
        out_specs=pl.BlockSpec((tm, H), lambda i: (i, 0)),
        out_shape=jax.ShapeDtypeStruct((n_pad, H), out_dtype),
        compiler_params=pltpu.CompilerParams(
            dimension_semantics=("parallel",),         # megacore on v7x
            vmem_limit_bytes=vmem_limit,
        ),
        cost_estimate=cost,
    )(x2, w, b, gamma, beta)

    if n_pad != N:
        out = out[:N]
    return out.reshape(orig_shape)


# ----------------------------------- main -----------------------------------
if __name__ == "__main__":
    key = jax.random.PRNGKey(0)
    kx, kw, kg, kb, kbb = jax.random.split(key, 5)

    B, S, H = 2, 8, 128        # lane-dense hidden size (multiple of 128)
    EPS = 1e-12                # BERT layer_norm_eps

    hidden_states = jax.random.normal(kx, (B, S, H), jnp.float32)
    dense_w = 0.05 * jax.random.normal(kw, (H, H), jnp.float32)
    dense_b = 0.05 * jax.random.normal(kbb, (H,), jnp.float32)     # natural [H]
    ln_gamma = 1.0 + 0.05 * jax.random.normal(kg, (H,), jnp.float32)
    ln_beta = 0.05 * jax.random.normal(kb, (H,), jnp.float32)

    fn = jax.jit(functools.partial(bert_prediction_head_transform,
                                   eps=EPS, act="gelu"))
    out = fn(hidden_states, dense_w, dense_b, ln_gamma, ln_beta)
    jax.block_until_ready(out)
    assert out.shape == (B, S, H)
    assert out.dtype == hidden_states.dtype   # output dtype follows input

    # Pure-JAX references (erf-exact gelu, same LayerNorm).
    def ref(x, w, b, g, bt, eps=EPS, match_mxu=False):
        if match_mxu:  # mirror the kernel's bf16 MXU operands (f32 accumulation)
            x = x.astype(jnp.bfloat16).astype(jnp.float32)
            w = w.astype(jnp.bfloat16).astype(jnp.float32)
        y = x @ w + b
        y = jax.nn.gelu(y, approximate=False)
        mu = y.mean(-1, keepdims=True)
        var = ((y - mu) ** 2).mean(-1, keepdims=True)
        return (y - mu) / jnp.sqrt(var + eps) * g + bt

    exp_matched = ref(hidden_states, dense_w, dense_b, ln_gamma, ln_beta,
                      match_mxu=True)
    exp_f32 = ref(hidden_states, dense_w, dense_b, ln_gamma, ln_beta,
                  match_mxu=False)
    err_matched = float(jnp.max(jnp.abs(out - exp_matched)))
    err_f32 = float(jnp.max(jnp.abs(out - exp_f32)))
    # Tight check against the matched-precision reference (validates the fused
    # math path); loose sanity check vs the all-f32 reference (bounds the
    # documented bf16-operand error).
    assert err_matched < 1e-2, f"matched-precision max abs error: {err_matched}"
    assert err_f32 < 5e-2, f"f32-reference max abs error: {err_f32}"

    print("KERNEL_OK")
</pallas_src>

<mosaic_0001>
module attributes {stable_mosaic.version = 11 : i64} {
  func.func @_transform_kernel(%arg0: i32, %arg1: memref<8x128xf32, #tpu.memory_space<vmem>>, %arg2: memref<128x128xbf16, #tpu.memory_space<vmem>>, %arg3: memref<1x128xf32, #tpu.memory_space<vmem>>, %arg4: memref<1x128xf32, #tpu.memory_space<vmem>>, %arg5: memref<1x128xf32, #tpu.memory_space<vmem>>, %arg6: memref<8x128xf32, #tpu.memory_space<vmem>>) attributes {dimension_semantics = [#tpu.dimension_semantics<parallel>], iteration_bounds = array<i64: 2>, scalar_prefetch = 0 : i64, scratch_operands = 0 : i64, tpu.core_type = #tpu.core_type<tc>, window_params = [{transform_indices = @transform_0, window_bounds = array<i64: 8, 128>}, {pipeline_mode = #tpu.pipeline_mode<synchronous>, transform_indices = @transform_1, window_bounds = array<i64: 128, 128>}, {pipeline_mode = #tpu.pipeline_mode<synchronous>, transform_indices = @transform_2, window_bounds = array<i64: 1, 128>}, {pipeline_mode = #tpu.pipeline_mode<synchronous>, transform_indices = @transform_3, window_bounds = array<i64: 1, 128>}, {pipeline_mode = #tpu.pipeline_mode<synchronous>, transform_indices = @transform_4, window_bounds = array<i64: 1, 128>}, {transform_indices = @transform_5, window_bounds = array<i64: 8, 128>}]} {
    %c0 = arith.constant 0 : index
    %c0_0 = arith.constant 0 : index
    %0 = vector.load %arg1[%c0, %c0_0] : memref<8x128xf32, #tpu.memory_space<vmem>>, vector<8x128xf32>
    %c0_1 = arith.constant 0 : index
    %c0_2 = arith.constant 0 : index
    %1 = vector.load %arg2[%c0_1, %c0_2] : memref<128x128xbf16, #tpu.memory_space<vmem>>, vector<128x128xbf16>
    %2 = arith.truncf %0 : vector<8x128xf32> to vector<8x128xbf16>
    %cst = arith.constant dense<0.000000e+00> : vector<8x128xf32>
    %3 = tpu.matmul %2, %1, %cst {dimension_numbers = #tpu.dot_dimension_numbers<[1], [0], [0], [1], [0, 0, 1, 1], [], []>} : vector<8x128xbf16>, vector<128x128xbf16>, vector<8x128xf32> -> vector<8x128xf32>
    %c0_3 = arith.constant 0 : index
    %c0_4 = arith.constant 0 : index
    %4 = vector.load %arg3[%c0_3, %c0_4] : memref<1x128xf32, #tpu.memory_space<vmem>>, vector<1x128xf32>
    %5 = vector.broadcast %4 : vector<1x128xf32> to vector<8x128xf32>
    %6 = arith.addf %3, %5 : vector<8x128xf32>
    %cst_5 = arith.constant 5.000000e-01 : f32
    %7 = vector.broadcast %cst_5 : f32 to vector<8x128xf32>
    %8 = arith.mulf %7, %6 : vector<8x128xf32>
    %cst_6 = arith.constant 0.707106769 : f32
    %9 = vector.broadcast %cst_6 : f32 to vector<8x128xf32>
    %10 = arith.mulf %6, %9 : vector<8x128xf32>
    %11 = math.absf %10 : vector<8x128xf32>
    %cst_7 = arith.constant 0.327591091 : f32
    %12 = vector.broadcast %cst_7 : f32 to vector<8x128xf32>
    %13 = arith.mulf %12, %11 : vector<8x128xf32>
    %cst_8 = arith.constant 1.000000e+00 : f32
    %14 = vector.broadcast %cst_8 : f32 to vector<8x128xf32>
    %15 = arith.addf %14, %13 : vector<8x128xf32>
    %16 = tpu.reciprocal %15 {approx = true} : vector<8x128xf32> -> vector<8x128xf32>
    %cst_9 = arith.constant 1.06140542 : f32
    %17 = vector.broadcast %cst_9 : f32 to vector<8x128xf32>
    %18 = arith.mulf %17, %16 : vector<8x128xf32>
    %cst_10 = arith.constant -1.45315206 : f32
    %19 = vector.broadcast %cst_10 : f32 to vector<8x128xf32>
    %20 = arith.addf %18, %19 : vector<8x128xf32>
    %21 = arith.mulf %20, %16 : vector<8x128xf32>
    %cst_11 = arith.constant 1.42141378 : f32
    %22 = vector.broadcast %cst_11 : f32 to vector<8x128xf32>
    %23 = arith.addf %21, %22 : vector<8x128xf32>
    %24 = arith.mulf %23, %16 : vector<8x128xf32>
    %cst_12 = arith.constant -0.284496725 : f32
    %25 = vector.broadcast %cst_12 : f32 to vector<8x128xf32>
    %26 = arith.addf %24, %25 : vector<8x128xf32>
    %27 = arith.mulf %26, %16 : vector<8x128xf32>
    %cst_13 = arith.constant 0.254829586 : f32
    %28 = vector.broadcast %cst_13 : f32 to vector<8x128xf32>
    %29 = arith.addf %27, %28 : vector<8x128xf32>
    %30 = arith.mulf %29, %16 : vector<8x128xf32>
    %cst_14 = arith.constant 0.000000e+00 : f32
    %31 = vector.broadcast %cst_14 : f32 to vector<8x128xf32>
    %32 = arith.subf %31, %11 : vector<8x128xf32>
    %33 = arith.mulf %32, %11 : vector<8x128xf32>
    %34 = math.exp %33 : vector<8x128xf32>
    %35 = arith.mulf %30, %34 : vector<8x128xf32>
    %cst_15 = arith.constant 1.000000e+00 : f32
    %36 = vector.broadcast %cst_15 : f32 to vector<8x128xf32>
    %37 = arith.subf %36, %35 : vector<8x128xf32>
    %cst_16 = arith.constant 0.000000e+00 : f32
    %38 = vector.broadcast %cst_16 : f32 to vector<8x128xf32>
    %39 = arith.cmpf oge, %10, %38 : vector<8x128xf32>
    %cst_17 = arith.constant 0.000000e+00 : f32
    %40 = vector.broadcast %cst_17 : f32 to vector<8x128xf32>
    %41 = arith.subf %40, %37 : vector<8x128xf32>
    %42 = arith.select %39, %37, %41 : vector<8x128xi1>, vector<8x128xf32>
    %cst_18 = arith.constant 1.000000e+00 : f32
    %43 = vector.broadcast %cst_18 : f32 to vector<8x128xf32>
    %44 = arith.addf %43, %42 : vector<8x128xf32>
    %45 = arith.mulf %8, %44 : vector<8x128xf32>
    %cst_19 = arith.constant dense<0.000000e+00> : vector<8xf32>
    %46 = vector.multi_reduction <add>, %45, %cst_19 [1] : vector<8x128xf32> to vector<8xf32>
    %47 = vector.shape_cast %46 : vector<8xf32> to vector<8x1xf32>
    %cst_20 = arith.constant 1.280000e+02 : f32
    %48 = vector.broadcast %cst_20 : f32 to vector<8x1xf32>
    %49 = arith.divf %47, %48 : vector<8x1xf32>
    %50 = arith.mulf %45, %45 : vector<8x128xf32>
    %cst_21 = arith.constant dense<0.000000e+00> : vector<8xf32>
    %51 = vector.multi_reduction <add>, %50, %cst_21 [1] : vector<8x128xf32> to vector<8xf32>
    %52 = vector.shape_cast %51 : vector<8xf32> to vector<8x1xf32>
    %cst_22 = arith.constant 1.280000e+02 : f32
    %53 = vector.broadcast %cst_22 : f32 to vector<8x1xf32>
    %54 = arith.divf %52, %53 : vector<8x1xf32>
    %55 = arith.mulf %49, %49 : vector<8x1xf32>
    %56 = arith.subf %54, %55 : vector<8x1xf32>
    %cst_23 = arith.constant 0.000000e+00 : f32
    %57 = vector.broadcast %cst_23 : f32 to vector<8x1xf32>
    %58 = arith.maximumf %56, %57 : vector<8x1xf32>
    %cst_24 = arith.constant 9.99999996E-13 : f32
    %59 = vector.broadcast %cst_24 : f32 to vector<8x1xf32>
    %60 = arith.addf %58, %59 : vector<8x1xf32>
    %61 = math.rsqrt %60 : vector<8x1xf32>
    %62 = vector.broadcast %49 : vector<8x1xf32> to vector<8x128xf32>
    %63 = arith.subf %45, %62 : vector<8x128xf32>
    %64 = vector.broadcast %61 : vector<8x1xf32> to vector<8x128xf32>
    %65 = arith.mulf %63, %64 : vector<8x128xf32>
    %c0_25 = arith.constant 0 : index
    %c0_26 = arith.constant 0 : index
    %66 = vector.load %arg4[%c0_25, %c0_26] : memref<1x128xf32, #tpu.memory_space<vmem>>, vector<1x128xf32>
    %67 = vector.broadcast %66 : vector<1x128xf32> to vector<8x128xf32>
    %68 = arith.mulf %65, %67 : vector<8x128xf32>
    %c0_27 = arith.constant 0 : index
    %c0_28 = arith.constant 0 : index
    %69 = vector.load %arg5[%c0_27, %c0_28] : memref<1x128xf32, #tpu.memory_space<vmem>>, vector<1x128xf32>
    %70 = vector.broadcast %69 : vector<1x128xf32> to vector<8x128xf32>
    %71 = arith.addf %68, %70 : vector<8x128xf32>
    %c0_29 = arith.constant 0 : index
    %c0_30 = arith.constant 0 : index
    %72 = vector.load %arg6[%c0_29, %c0_30] : memref<8x128xf32, #tpu.memory_space<vmem>>, vector<8x128xf32>
    tpu.vector_store %arg6[%c0_29, %c0_30], %71 {strides = array<i32>} : memref<8x128xf32, #tpu.memory_space<vmem>>, vector<8x128xf32>,
    return
  }
  func.func @transform_0(%arg0: i32) -> (i32, i32) {
    %c0_i32 = arith.constant 0 : i32
    %c0_i32_0 = arith.constant 0 : i32
    return %arg0, %c0_i32 : i32, i32
  }
  func.func @transform_1(%arg0: i32) -> (i32, i32) {
    %c0_i32 = arith.constant 0 : i32
    %c0_i32_0 = arith.constant 0 : i32
    %c0_i32_1 = arith.constant 0 : i32
    return %c0_i32, %c0_i32_0 : i32, i32
  }
  func.func @transform_2(%arg0: i32) -> (i32, i32) {
    %c0_i32 = arith.constant 0 : i32
    %c0_i32_0 = arith.constant 0 : i32
    %c0_i32_1 = arith.constant 0 : i32
    return %c0_i32, %c0_i32_0 : i32, i32
  }
  func.func @transform_3(%arg0: i32) -> (i32, i32) {
    %c0_i32 = arith.constant 0 : i32
    %c0_i32_0 = arith.constant 0 : i32
    %c0_i32_1 = arith.constant 0 : i32
    return %c0_i32, %c0_i32_0 : i32, i32
  }
  func.func @transform_4(%arg0: i32) -> (i32, i32) {
    %c0_i32 = arith.constant 0 : i32
    %c0_i32_0 = arith.constant 0 : i32
    %c0_i32_1 = arith.constant 0 : i32
    return %c0_i32, %c0_i32_0 : i32, i32
  }
  func.func @transform_5(%arg0: i32) -> (i32, i32) {
    %c0_i32 = arith.constant 0 : i32
    %c0_i32_0 = arith.constant 0 : i32
    return %arg0, %c0_i32 : i32, i32
  }
}

</mosaic_0001>

<bundles_post_ra>
// kernel: bert_prediction_head_transform.1
= control target key start
LH: loop header
LB: loop body
LE: loop exit
PB: predicated region body
PF: predicated region fallthrough
CT: control target
= control target key end

     0   :  { %10 = vsyncpa [#allocation3], 0  ;;  %s759_s0 = inlined_call_operand.vmem [shape: f32[16,128], index: 0, kind: input, shape index: {}]   ;;  %s760_s1 = inlined_call_operand.vmem [shape: bf16[128,128], index: 1, kind: input, shape index: {}]   ;;  %s761_s2 = inlined_call_operand.vmem [shape: f32[1,128], index: 2, kind: input, shape index: {}]   ;;  %s762_s3 = inlined_call_operand.vmem [shape: f32[1,128], index: 3, kind: input, shape index: {}]   ;;  %s763_s4 = inlined_call_operand.vmem [shape: f32[1,128], index: 4, kind: input, shape index: {}]   ;;  %s764_s5 = inlined_call_operand.hbm [shape: f32[16,128], index: 5, kind: output, shape index: {}]  }
   0x1   :  { %12 = vsyncpa [#allocation3 + $0x1], 0  ;;  %s641_s18 = smov 0   ;;  %s643_s19 = smov 0  }
   0x2   :  { %s645_s20 = smov 0   ;;  %s647_s21 = smov 0  }
   0x3 LB: > { %s662_s22 = sadd.s32 4294967295, %s608_s21   ;;  %s445_s23 = sadd.s32 4294967294, %s608_s21   ;;  %s608_s21 = sphi %s647_s21, %s770_s21   ;;  %s604_s20 = sphi %s645_s20, %s769_s20   ;;  %s600_s19 = sphi %s643_s19, %s768_s19   ;;  %s596_s18 = sphi %s641_s18, %s767_s18  }
   0x4   : > { %s666_s24 = sadd.s32 1, %s608_s21   ;;  %s135_s25 = sadd.s32 1, %s604_s20 }
   0x5   : > { %s132_s26 = ssub.s32 %s608_s21, %s666_s24  ;;  %p145_p0 = scmp.ne.s32.totalorder %s604_s20, %s600_s19 }
   0x6   : > { %p133_p1 = scmp.eq.s32.totalorder %s132_s26, 0  ;;  %p146_p2 = scmp.eq.s32.totalorder %s662_s22, 1 }
   0x7   : > { %p151_p3 = scmp.ne.s32.totalorder %s600_s19, %s596_s18  ;;  %p152_p4 = scmp.eq.s32.totalorder %s445_s23, 1 }
   0x8   : > { %s677_s27 = scalar_select %p133_p1, %s604_s20, %s135_s25  }
   0x9   : > { %p679_p5 = por %p146_p2, %p145_p0  ;;  %p683_p6 = por %p152_p4, %p151_p3 }
   0xa   : > { %p448_p7 = scmp.ge.s32.totalorder %s608_s21, 1  ;;  %p189_p8 = scmp.lt.s32.totalorder %s608_s21, 3 }
   0xc   : > { %p190_p9 = pnand %p448_p7, %p189_p8 }
   0xd   : > { %p216_p10 = scmp.lt.s32.totalorder (!%p190_p9), %s662_s22, 1  ;;  %s213_s12 = sand.u32 (!%p190_p9), 1, %s600_s19  }
   0xe   : > { %193 = sbr.rel (%p190_p9) target bundleno = 382 (0x17e), region = 40  ;;  %s449_s13 = sshll.u32 (!%p190_p9), %s213_s12, 3 }
   0xf   : > { %s484_s14 = sshll.u32 (!%p190_p9), %s662_s22, 3  ;;  %s371_s8 = scalar_lea.sflag (!%p190_p9), [#allocation3], %s213_s12 }
  0x10   : > { %s381_s25 = scalar_lea.hbm (!%p190_p9), %s764_s5, %s484_s14 }
  0x13   : > { %v494_v0 = vld [vmem:[%s760_s1 + $0x38] sm:$0xff]  ;;  %v493_v1 = vld [vmem:[%s760_s1 + $0x30] sm:$0xff]  ;;  %v492_v2 = vld [vmem:[%s760_s1 + $0x28] sm:$0xff]  ;;  %s217_s15 = scalar_select %p216_p10, %s662_s22, 1  ;;  %v610_v40 = vmov 128.0  }
  0x14   : > { %290 = vmatpush.bf16.msra.mxu0 %v494_v0  ;;  %v491_v3 = vld [vmem:[%s760_s1 + $0x20] sm:$0xff]  ;;  %v490_v4 = vld [vmem:[%s760_s1 + $0x18] sm:$0xff]  ;;  %v489_v5 = vld [vmem:[%s760_s1 + $0x10] sm:$0xff]  ;;  %s215_s22 = scalar_lea.vmem [#allocation2], %s449_s13 }
  0x15   : > { %s450_s23 = sshll.u32 %s217_s15, 3  ;;  %v488_v6 = vld [vmem:[%s760_s1 + $0x8] sm:$0xff]  ;;  %v487_v7 = vld [vmem:[%s760_s1] sm:$0xff]  ;;  %s383_s6 = sshll.u32 %s215_s22, 4  ;;  %s384_s6 = int_to_ptr.vmem [resolvable:$true] %s383_s6 }
  0x16   : > { %s219_s7 = scalar_lea.vmem %s759_s0, %s450_s23  ;;  %v535_v10 = vld [vmem:[%s761_s2] ss:$0 sm:$0xff]  ;;  %s566_s15 = scalar_lea.hbm %s764_s5, 16 }
  0x17   : > { %v220_v8 = vld [vmem:[%s219_s7] sm:$0xff]  ;;  %s385_s7 = sshll.u32 %s381_s25, 4  ;;  %s386_s7 = int_to_ptr.hbm [resolvable:$true] %s385_s7 }
  0x18   : > { %291 = vmatpush.bf16.msra.mxu0 %v493_v1  ;;  %v237_v9 = vpack.c.bf16 %v220_v8, %v220_v8  ;;  %v536_v62 = vld [vmem:[%s762_s3] ss:$0 sm:$0xff]  ;;  %s560_s9 = sshra.s32 %s386_s7, 4  ;;  %s561_s9 = int_to_ptr.hbm [resolvable:$true] %s560_s9 }
  0x19   : > { %v537_v1 = vld [vmem:[%s763_s4] ss:$0 sm:$0xff]  ;;  %s562_s10 = scalar_lea.hbm %s561_s9, 8  ;;  %p567_p0 = scmp.lt.s32.totalorder %s561_s9, %s764_s5 }
  0x1a   : > { %p563_p11 = scmp.ne.s32.totalorder %s561_s9, %s562_s10  ;;  %p568_p1 = scmp.lt.s32.totalorder %s566_s15, %s562_s10 }
  0x1c   : > { %292 = vmatpush.bf16.msra.mxu0 %v492_v2  ;;  %p564_p12 = pnand %p563_p11, %p679_p5  ;;  %p569_p2 = por %p568_p1, %p567_p0 }
  0x1e   : > { %p565_p13 = pneg %p564_p12 }
  0x20   : > { %293 = vmatpush.bf16.msra.mxu0 %v491_v3  ;;  %p570_p3 = pnand %p569_p2, %p565_p13 }
  0x24   : > { %294 = vmatpush.bf16.msra.mxu0 %v490_v4 }
  0x28   : > { %295 = vmatpush.bf16.msra.mxu0 %v489_v5 }
  0x2c   : > { %296 = vmatpush.bf16.msra.mxu0 %v488_v6 }
  0x30   : > { %297 = vmatpush.bf16.msra.mxu0 %v487_v7 }
  0x33   : > { %298 = vmatmul.bf16.vlgmr.msra.gmra.mxu0 %v237_v9 }
  0xb0   : > { %v299_v11 = vpop.f32.mrf.mxu0 }
  0xb1   : > { %v300_v12 = vadd.f32 %v535_v10, %v299_v11 }
  0xb3   : > { %v304_v13 = vmul.f32 0.70710677, %v300_v12  ;;  %v303_v36 = vmul.f32 0.5, %v300_v12 }
  0xb5   : > { %v305_v14 = vand.u32 2147483647, %v304_v13  ;;  %vm324_vm0 = vcmp.ge.f32.partialorder %v304_v13, 0.0 }
  0xb7   : > { %v306_v15 = vmul.f32 0.3275911, %v305_v14  ;;  %v318_v19 = vsub.f32 0.0, %v305_v14 }
  0xb8   : > { %v301_v16 = vpop.f32.mrf.mxu0 }
  0xb9   : > { %v307_v17 = vadd.f32 1.0, %v306_v15  ;;  %v319_v22 = vmul.f32 %v318_v19, %v305_v14 }
  0xbb   : > { %538 = vrcp.f32 %v307_v17  ;;  %v320_v25 = vmul.f32 1.442695, %v319_v22 }
  0xbd   : > { %540 = vpow2.f32 %v320_v25 }
  0xbe   : > { %542 = vrcp.f32 %v610_v40 }
  0xc1   : > { %v539_v18 = vpop.eup %538 }
  0xc2   : > { %v309_v20 = vmul.f32 1.0614054, %v539_v18 }
  0xc3   : > { %v541_v31 = vpop.eup %540 }
  0xc4   : > { %v310_v21 = vadd.f32 -1.4531521, %v309_v20  ;;  %v543_v41 = vpop.eup %542 }
  0xc5   : > { %v332_v42 = vmul.f32 128.0, %v543_v41  ;;  %vm336_vm1 = vweird.f32 %v543_v41 }
  0xc6   : > { %v311_v23 = vmul.f32 %v539_v18, %v310_v21 }
  0xc7   : > { %v333_v43 = vsub.f32 1.0, %v332_v42 }
  0xc8   : > { %v312_v24 = vadd.f32 1.4214138, %v311_v23 }
  0xc9   : > { %v334_v44 = vmul.f32 %v543_v41, %v333_v43 }
  0xca   : > { %v313_v26 = vmul.f32 %v539_v18, %v312_v24 }
  0xcb   : > { %v335_v45 = vadd.f32 %v543_v41, %v334_v44 }
  0xcc   : > { %v314_v27 = vadd.f32 -0.28449672, %v313_v26 }
  0xcd   : > { %v337_v47 = vsel %vm336_vm1, %v543_v41, %v335_v45 }
  0xce   : > { %v315_v28 = vmul.f32 %v539_v18, %v314_v27 }
  0xd0   : > { %v316_v29 = vadd.f32 0.2548296, %v315_v28 }
  0xd2   : > { %v317_v30 = vmul.f32 %v539_v18, %v316_v29 }
  0xd4   : > { %v322_v32 = vmul.f32 %v541_v31, %v317_v30 }
  0xd6   : > { %v323_v33 = vsub.f32 1.0, %v322_v32 }
  0xd8   : > { %v325_v34 = vsub.f32 0.0, %v323_v33 }
  0xda   : > { %v326_v35 = vsel %vm324_vm0, %v323_v33, %v325_v34 }
  0xdb   : > { %v327_v37 = vadd.f32 1.0, %v326_v35 }
  0xdd   : > { %v328_v38 = vmul.f32 %v327_v37, %v303_v36 }
  0xdf   : > { %329 = vadd.xlane.f32.xlu0 %v328_v38  ;;  %v339_v39 = vmul.f32 %v328_v38, %v328_v38 }
  0xe7   : > { %340 = vadd.xlane.f32.xlu0 %v339_v39 }
 0x152   : > { %v330_v46 = vpop.xlane.xlu0 %329 }
 0x153   : > { %v338_v48 = vmul.f32 %v337_v47, %v330_v46 }
 0x155   : > { %v343_v50 = vmul.f32 %v338_v48, %v338_v48  ;;  %v357_v61 = vsub.f32 %v328_v38, %v338_v48 }
 0x15a   : > { %v341_v49 = vpop.xlane.xlu0 %340 }
 0x15b   : > { %v342_v51 = vmul.f32 %v341_v49, %v337_v47 }
 0x15d   : > { %v344_v52 = vsub.f32 %v342_v51, %v343_v50 }
 0x15f   : > { %v345_v53 = vmax.f32 %v344_v52, 0.0 }
 0x161   : > { %v346_v54 = vadd.f32 1e-12, %v345_v53 }
 0x163   : > { %544 = vrsqrt.f32 %v346_v54  ;;  %vm353_vm3 = vweird.f32 %v346_v54 }
 0x169   : > { %v545_v55 = vpop.eup %544 }
 0x16a   : > { %v348_v56 = vmul.f32 %v545_v55, %v346_v54  ;;  %vm354_vm2 = vweird.f32 %v545_v55 }
 0x16b   : > { %vm355_vm4 = vmor %vm353_vm3, %vm354_vm2 }
 0x16c   : > { %v349_v57 = vmul.f32 %v545_v55, %v348_v56 }
 0x16e   : > { %v350_v58 = vmul.f32 0.5, %v349_v57 }
 0x170   : > { %v351_v59 = vsub.f32 1.5, %v350_v58 }
 0x172   : > { %v352_v60 = vmul.f32 %v545_v55, %v351_v59 }
 0x174   : > { %v356_v63 = vsel %vm355_vm4, %v545_v55, %v352_v60 }
 0x175   : > { %v358_v0 = vmul.f32 %v357_v61, %v356_v63 }
 0x177   : > { %v363_v2 = vmul.f32 %v536_v62, %v358_v0 }
 0x179   : > { %v368_v3 = vadd.f32 %v537_v1, %v363_v2 }
 0x17b   : > { %369 = vst [vmem:[%s215_s22] sm:$0xff] %v368_v3 }
 0x17c   : > { %573 = shalt.err (!%p570_p3)
}
 0x17d   : > { %495 = dma.vmem_to_hbm [thread:$0]  (%p679_p5), %s384_s6, 128, %s386_s7, %s371_s8  }
 0x17e PF: > { %p501_p4 = scmp.ge.s32.totalorder %s608_s21, 2  ;;  %s397_s12 = sand.u32 1, %s596_s18  }
 0x17f   : > { %s398_s17 = scalar_lea.sflag [#allocation3], %s397_s12 }
 0x180   : > { %p498_p7 = pnand %p501_p4, %p683_p6 }
 0x182   : > { %p499_p8 = pneg %p498_p7 }
 0x184   : > { %591 = dma.done.wait (%p499_p8), %s398_s17, 128  }
 0x185   : > { %593 = vsyncadd (%p499_p8), %s398_s17, 4294967168  ;;  %p15_p9 = scmp.ge.s32.totalorder %s666_s24, 4   ;;  %s767_s18 = smov %s600_s19 }
 0x186   : > { %s768_s19 = smov %s604_s20  ;;  %s769_s20 = smov %s677_s27 }
 0x187   : > { %s770_s21 = smov %s666_s24  ;;  %17 = sbr.rel (!%p15_p9) target bundleno = 3 (0x3), region = 75 }
 0x18c   :  { %404 = vsyncpa [#allocation3], 1 }
 0x18d   :  { %406 = vsyncpa [#allocation3 + $0x1], 1 }

</bundles_post_ra>
